<compile_context>
chip_gen: v6e
topology: v6e:2x2x1
jax: 0.10.0
libtpu: 0.0.40
codegen_flags: <defaults>
</compile_context>

<pallas_src>
import functools
import math

import jax
import jax.numpy as jnp
from jax.experimental import pallas as pl
from jax.experimental.pallas import tpu as pltpu


def _round_up(n, m):
    return ((n + m - 1) // m) * m


# ---------------------------------------------------------------------------
# Fused MLP kernel: chains all layers inside one kernel body.
#   refs = (x_ref, w0, b0, w1, b1, ..., w_last, b_last, o_ref)
# last_mode:
#   "matmul"  -> final layer is h @ w + b (w is (in, out))
#   "vpu_col" -> output_size == 1, unfolded: w is the (1, width) weight ROW;
#                do VPU multiply + XLU lane-reduce instead of a 1-wide matmul.
# ---------------------------------------------------------------------------
def _mlp_kernel(x_ref, *refs, activation, last_mode):
    o_ref = refs[-1]
    wb = refs[:-1]
    n_layers = len(wb) // 2

    h = x_ref[...].astype(jnp.float32)
    for layer in range(n_layers - 1):               # hidden layers (with act)
        w = wb[2 * layer][...]
        b = wb[2 * layer + 1][...]                  # (1, N) broadcasts over rows
        h = jnp.dot(h, w, preferred_element_type=jnp.float32) + b
        if activation == "tanh":
            h = jnp.tanh(h)
        else:                                       # "relu"
            h = jnp.maximum(h, 0.0)

    w = wb[-2][...]
    b = wb[-1][...]
    if last_mode == "vpu_col":
        # (tile, width) * (1, width) on the VPU, lane-reduce on the XLU.
        out = jnp.sum(h * w, axis=-1, keepdims=True) + b
    else:
        out = jnp.dot(h, w, preferred_element_type=jnp.float32) + b
    o_ref[...] = out.astype(o_ref.dtype)


# ---------------------------------------------------------------------------
# Forward wrapper: single fused pallas_call, streamed over the batch.
# ---------------------------------------------------------------------------
def mlp_forward(x, model, *, block_batch=8192, single_shot_rows=512):
    """x: (B, input_size) float32 -> (B, output_size)."""
    B, K = x.shape
    activation = model["activation"]
    output_size = model["output_size"]
    fold = model["fold"]

    use_fold = fold > 1 and B % fold == 0 and B >= fold
    if use_fold:
        f = fold
        params = model["packed_params"]
        x_in = x.reshape(B // f, f * K)             # contiguous -> free
        last_mode = "matmul"
        flat = [a for wb in params for a in wb]
        n_out_cols = f * output_size
    else:
        f = 1
        params = model["params"]
        x_in = x
        if output_size == 1:
            last_mode = "vpu_col"
            flat = [a for wb in params[:-1] for a in wb]
            flat += [model["w_last_row"], params[-1][1]]   # (1,width), (1,1)
        else:
            last_mode = "matmul"
            flat = [a for wb in params for a in wb]
        n_out_cols = output_size

    rows, kf = x_in.shape
    kernel = functools.partial(_mlp_kernel, activation=activation,
                               last_mode=last_mode)
    out_shape = jax.ShapeDtypeStruct((rows, n_out_cols), x.dtype)

    # Block size: <= block_batch original rows, multiple of 8, and small enough
    # that there are >= 2 grid steps (v7x megacore via "parallel" semantics).
    block_rows_max = max(8, _round_up(max(1, block_batch // f), 8))
    block_rows = min(block_rows_max, _round_up(pl.cdiv(rows, 2), 8))

    if rows <= single_shot_rows or block_rows >= rows:
        # Small batch: one shot, no grid -> no pipeline bookkeeping at all.
        # (Launch-overhead-bound; not worth further in-kernel tuning.)
        out = pl.pallas_call(kernel, out_shape=out_shape)(x_in, *flat)
    else:
        num_blocks = pl.cdiv(rows, block_rows)      # no jnp.pad: Pallas masks
        in_specs = [pl.BlockSpec((block_rows, kf), lambda i: (i, 0))]
        for a in flat:
            # Constant block index -> stays VMEM-resident, never re-DMA'd.
            in_specs.append(pl.BlockSpec(a.shape, lambda i: (0, 0)))
        out = pl.pallas_call(
            kernel,
            out_shape=out_shape,
            grid=(num_blocks,),
            in_specs=in_specs,
            out_specs=pl.BlockSpec((block_rows, n_out_cols), lambda i: (i, 0)),
            compiler_params=pltpu.CompilerParams(
                dimension_semantics=("parallel",),  # shard batch across TCs
            ),
        )(x_in, *flat)

    return out.reshape(B, output_size) if use_fold else out


# ---------------------------------------------------------------------------
# Parameter init mirroring the PyTorch module __init__.
# Weights stored kernel-ready as (in, out); biases as (1, out).
# ---------------------------------------------------------------------------
def init_params(key, input_size, output_size, depth, width, activation):
    params = []
    prev = input_size
    for _ in range(depth):
        key, kw, kb = jax.random.split(key, 3)
        if activation == "tanh":
            bound = math.sqrt(6.0 / (prev + width))            # xavier_uniform
        else:
            bound = math.sqrt(2.0) * math.sqrt(3.0 / prev)     # kaiming_uniform
        w = jax.random.uniform(kw, (prev, width), jnp.float32, -bound, bound)
        bb = 1.0 / math.sqrt(prev)
        b = jax.random.uniform(kb, (1, width), jnp.float32, -bb, bb)
        params.append((w, b))
        prev = width
    # final layer: default PyTorch Linear init
    key, kw, kb = jax.random.split(key, 3)
    bound = 1.0 / math.sqrt(prev)
    w = jax.random.uniform(kw, (prev, output_size), jnp.float32, -bound, bound)
    b = jax.random.uniform(kb, (1, output_size), jnp.float32, -bound, bound)
    params.append((w, b))
    return params


def _fold_factor(width):
    # Fold multiple batch rows into one folded row so the feature dim fills
    # all 128 lanes (and much more of the MXU). Only when width divides 128.
    return 128 // width if (width < 128 and 128 % width == 0) else 1


def pack_params(params, fold):
    """Block-diagonal packing: W -> kron(I_fold, W), b -> tile(b, fold)."""
    if fold <= 1:
        return list(params)
    packed = []
    for w, b in params:
        eye = jnp.eye(fold, dtype=w.dtype)
        packed.append((jnp.kron(eye, w), jnp.tile(b, (1, fold))))
    return packed


def build_model(key, input_size, output_size, depth, width, activation):
    params = init_params(key, input_size, output_size, depth, width, activation)
    fold = _fold_factor(width)
    return {
        "activation": activation,
        "output_size": output_size,
        "params": params,                         # logical (in,out)/(1,out)
        "packed_params": pack_params(params, fold),
        "fold": fold,
        # pre-transposed final weight for the VPU final-layer path
        "w_last_row": params[-1][0].T if output_size == 1 else None,
    }


# ---------------------------------------------------------------------------
# Pure-JAX reference for correctness check
# ---------------------------------------------------------------------------
def reference_forward(x, params, activation):
    act = jnp.tanh if activation == "tanh" else (lambda v: jnp.maximum(v, 0.0))
    h = x
    for w, b in params[:-1]:
        h = act(h @ w + b)
    w, b = params[-1]
    return h @ w + b


if __name__ == "__main__":
    input_size = 32        # stands in for train_X.shape[1]
    output_size = 1
    depth = 3
    width = 32

    key = jax.random.PRNGKey(0)
    key, kp = jax.random.split(key)
    model = build_model(kp, input_size, output_size, depth, width, "tanh")

    # 1) folded (fold=4), single-shot path
    key, kx = jax.random.split(key)
    x1 = jax.random.normal(kx, (24, input_size), jnp.float32)
    o1 = jax.block_until_ready(mlp_forward(x1, model))
    r1 = reference_forward(x1, model["params"], "tanh")
    assert o1.shape == (24, output_size), o1.shape
    assert jnp.allclose(o1, r1, atol=1e-5, rtol=1e-5), "folded single-shot mismatch"

    # 2) folded, gridded path with a partial last block (80 rows -> 20 folded
    #    rows, forced 8-row folded tiles -> 3 blocks, last one partial; no pad)
    key, kx = jax.random.split(key)
    x2 = jax.random.normal(kx, (80, input_size), jnp.float32)
    o2 = jax.block_until_ready(
        mlp_forward(x2, model, block_batch=32, single_shot_rows=4))
    r2 = reference_forward(x2, model["params"], "tanh")
    assert o2.shape == (80, output_size), o2.shape
    assert jnp.allclose(o2, r2, atol=1e-5, rtol=1e-5), "folded gridded mismatch"

    # 3) unfolded fallback (B=21 not divisible by fold), gridded with partial
    #    last block; final layer computed on VPU + lane reduce
    key, kx = jax.random.split(key)
    x3 = jax.random.normal(kx, (21, input_size), jnp.float32)
    o3 = jax.block_until_ready(
        mlp_forward(x3, model, block_batch=8, single_shot_rows=4))
    r3 = reference_forward(x3, model["params"], "tanh")
    assert o3.shape == (21, output_size), o3.shape
    assert jnp.allclose(o3, r3, atol=1e-5, rtol=1e-5), "unfolded gridded mismatch"

    # 4) relu activation, folded single-shot path
    key, kp2, kx = jax.random.split(key, 3)
    model_relu = build_model(kp2, input_size, output_size, depth, width, "relu")
    x4 = jax.random.normal(kx, (16, input_size), jnp.float32)
    o4 = jax.block_until_ready(mlp_forward(x4, model_relu))
    r4 = reference_forward(x4, model_relu["params"], "relu")
    assert o4.shape == (16, output_size), o4.shape
    assert jnp.allclose(o4, r4, atol=1e-5, rtol=1e-5), "relu path mismatch"

    print("KERNEL_OK")
</pallas_src>

<mosaic_0001>
module attributes {stable_mosaic.version = 11 : i64} {
  func.func @_mlp_kernel(%arg0: memref<6x128xf32, #tpu.memory_space<vmem>>, %arg1: memref<128x128xf32, #tpu.memory_space<vmem>>, %arg2: memref<1x128xf32, #tpu.memory_space<vmem>>, %arg3: memref<128x128xf32, #tpu.memory_space<vmem>>, %arg4: memref<1x128xf32, #tpu.memory_space<vmem>>, %arg5: memref<128x128xf32, #tpu.memory_space<vmem>>, %arg6: memref<1x128xf32, #tpu.memory_space<vmem>>, %arg7: memref<128x4xf32, #tpu.memory_space<vmem>>, %arg8: memref<1x4xf32, #tpu.memory_space<vmem>>, %arg9: memref<6x4xf32, #tpu.memory_space<vmem>>) attributes {dimension_semantics = [], scalar_prefetch = 0 : i64, scratch_operands = 0 : i64, tpu.core_type = #tpu.core_type<tc>} {
    %c0 = arith.constant 0 : index
    %c0_0 = arith.constant 0 : index
    %0 = vector.load %arg0[%c0, %c0_0] : memref<6x128xf32, #tpu.memory_space<vmem>>, vector<6x128xf32>
    %c0_1 = arith.constant 0 : index
    %c0_2 = arith.constant 0 : index
    %1 = vector.load %arg1[%c0_1, %c0_2] : memref<128x128xf32, #tpu.memory_space<vmem>>, vector<128x128xf32>
    %c0_3 = arith.constant 0 : index
    %c0_4 = arith.constant 0 : index
    %2 = vector.load %arg2[%c0_3, %c0_4] : memref<1x128xf32, #tpu.memory_space<vmem>>, vector<1x128xf32>
    %cst = arith.constant dense<0.000000e+00> : vector<6x128xf32>
    %3 = tpu.matmul %0, %1, %cst {dimension_numbers = #tpu.dot_dimension_numbers<[1], [0], [0], [1], [0, 0, 1, 1], [], []>} : vector<6x128xf32>, vector<128x128xf32>, vector<6x128xf32> -> vector<6x128xf32>
    %4 = vector.broadcast %2 : vector<1x128xf32> to vector<6x128xf32>
    %5 = arith.addf %3, %4 : vector<6x128xf32>
    %6 = math.tanh %5 : vector<6x128xf32>
    %c0_5 = arith.constant 0 : index
    %c0_6 = arith.constant 0 : index
    %7 = vector.load %arg3[%c0_5, %c0_6] : memref<128x128xf32, #tpu.memory_space<vmem>>, vector<128x128xf32>
    %c0_7 = arith.constant 0 : index
    %c0_8 = arith.constant 0 : index
    %8 = vector.load %arg4[%c0_7, %c0_8] : memref<1x128xf32, #tpu.memory_space<vmem>>, vector<1x128xf32>
    %cst_9 = arith.constant dense<0.000000e+00> : vector<6x128xf32>
    %9 = tpu.matmul %6, %7, %cst_9 {dimension_numbers = #tpu.dot_dimension_numbers<[1], [0], [0], [1], [0, 0, 1, 1], [], []>} : vector<6x128xf32>, vector<128x128xf32>, vector<6x128xf32> -> vector<6x128xf32>
    %10 = vector.broadcast %8 : vector<1x128xf32> to vector<6x128xf32>
    %11 = arith.addf %9, %10 : vector<6x128xf32>
    %12 = math.tanh %11 : vector<6x128xf32>
    %c0_10 = arith.constant 0 : index
    %c0_11 = arith.constant 0 : index
    %13 = vector.load %arg5[%c0_10, %c0_11] : memref<128x128xf32, #tpu.memory_space<vmem>>, vector<128x128xf32>
    %c0_12 = arith.constant 0 : index
    %c0_13 = arith.constant 0 : index
    %14 = vector.load %arg6[%c0_12, %c0_13] : memref<1x128xf32, #tpu.memory_space<vmem>>, vector<1x128xf32>
    %cst_14 = arith.constant dense<0.000000e+00> : vector<6x128xf32>
    %15 = tpu.matmul %12, %13, %cst_14 {dimension_numbers = #tpu.dot_dimension_numbers<[1], [0], [0], [1], [0, 0, 1, 1], [], []>} : vector<6x128xf32>, vector<128x128xf32>, vector<6x128xf32> -> vector<6x128xf32>
    %16 = vector.broadcast %14 : vector<1x128xf32> to vector<6x128xf32>
    %17 = arith.addf %15, %16 : vector<6x128xf32>
    %18 = math.tanh %17 : vector<6x128xf32>
    %c0_15 = arith.constant 0 : index
    %c0_16 = arith.constant 0 : index
    %19 = vector.load %arg7[%c0_15, %c0_16] : memref<128x4xf32, #tpu.memory_space<vmem>>, vector<128x4xf32>
    %c0_17 = arith.constant 0 : index
    %c0_18 = arith.constant 0 : index
    %20 = vector.load %arg8[%c0_17, %c0_18] : memref<1x4xf32, #tpu.memory_space<vmem>>, vector<1x4xf32>
    %cst_19 = arith.constant dense<0.000000e+00> : vector<6x4xf32>
    %21 = tpu.matmul %18, %19, %cst_19 {dimension_numbers = #tpu.dot_dimension_numbers<[1], [0], [0], [1], [0, 0, 1, 1], [], []>} : vector<6x128xf32>, vector<128x4xf32>, vector<6x4xf32> -> vector<6x4xf32>
    %22 = vector.broadcast %20 : vector<1x4xf32> to vector<6x4xf32>
    %23 = arith.addf %21, %22 : vector<6x4xf32>
    %c0_20 = arith.constant 0 : index
    %c0_21 = arith.constant 0 : index
    %24 = vector.load %arg9[%c0_20, %c0_21] : memref<6x4xf32, #tpu.memory_space<vmem>>, vector<6x4xf32>
    tpu.vector_store %arg9[%c0_20, %c0_21], %23 {strides = array<i32>} : memref<6x4xf32, #tpu.memory_space<vmem>>, vector<6x4xf32>,
    return
  }
}

</mosaic_0001>

<bundles_post_ra>
// kernel: tpu_custom_call.1
= control target key start
LH: loop header
LB: loop body
LE: loop exit
PB: predicated region body
PF: predicated region fallthrough
CT: control target
= control target key end

     0   :  { %14 = vsyncpa [#allocation3], 0  ;;  %s993_s0 = inlined_call_operand.hbm [shape: f32[6,128], index: 0, kind: input, shape index: {}]   ;;  %s994_s1 = inlined_call_operand.vmem [shape: f32[128,128], index: 1, kind: input, shape index: {}]   ;;  %s995_s2 = inlined_call_operand.vmem [shape: f32[1,128], index: 2, kind: input, shape index: {}]   ;;  %s996_s3 = inlined_call_operand.hbm [shape: f32[128,128], index: 3, kind: input, shape index: {}]   ;;  %s997_s4 = inlined_call_operand.vmem [shape: f32[1,128], index: 4, kind: input, shape index: {}]   ;;  %s998_s5 = inlined_call_operand.hbm [shape: f32[128,128], index: 5, kind: input, shape index: {}]   ;;  %s999_s6 = inlined_call_operand.vmem [shape: f32[1,128], index: 6, kind: input, shape index: {}]   ;;  %s1000_s7 = inlined_call_operand.vmem [shape: f32[128,4], index: 7, kind: input, shape index: {}]   ;;  %s1001_s8 = inlined_call_operand.vmem [shape: f32[1,4], index: 8, kind: input, shape index: {}]   ;;  %s1002_s9 = inlined_call_operand.vmem [shape: f32[6,4], index: 9, kind: output, shape index: {}]  }
   0x1   :  { %15 = vsyncpa [#allocation5], 0  ;;  %s744_s30 = smov [#allocation4]  }
   0x2   :  { %s35_s10 = sshll.u32 %s744_s30, 4  ;;  %s36_s10 = int_to_ptr.vmem [resolvable:$true] %s35_s10 }
   0x3   :  { %s688_s11 = scalar_lea.vmem %s36_s10, 2048  ;;  %p693_p1 = scmp.lt.s32.totalorder %s36_s10, %s36_s10 }
   0x4   :  { %p689_p0 = scmp.ne.s32.totalorder %s36_s10, %s688_s11  ;;  %p694_p2 = scmp.lt.s32.totalorder %s688_s11, %s688_s11 }
   0x6   :  { %p695_p3 = por %p694_p2, %p693_p1 }
   0x8   :  { %p696_p4 = pnand %p695_p3, %p689_p0 }
   0xa   :  { %699 = shalt.err (!%p696_p4)
}
   0xb   :  { %s745_s12 = smov 128   ;;  %s746_s13 = smov 8  }
   0xc   :  { %41 = dma.hbm_to_vmem [thread:$0]  %s996_s3, 2048, %s36_s10, [#allocation5], %s745_s12, %s745_s12, %s746_s13  }
   0xd   :  { %s747_s16 = smov [#allocation2]   ;;  %s748_s18 = smov [#allocation6]  }
   0xe   :  { %s22_s17 = sshll.u32 %s747_s16, 4  ;;  %s49_s19 = sshll.u32 %s748_s18, 4  ;;  %s23_s17 = int_to_ptr.vmem [resolvable:$true] %s22_s17  ;;  %s50_s19 = int_to_ptr.vmem [resolvable:$true] %s49_s19 }
   0xf   :  { %s708_s20 = scalar_lea.vmem %s23_s17, 128  ;;  %p713_p6 = scmp.lt.s32.totalorder %s23_s17, %s23_s17 }
  0x10   :  { %p709_p5 = scmp.ne.s32.totalorder %s23_s17, %s708_s20  ;;  %p714_p7 = scmp.lt.s32.totalorder %s708_s20, %s708_s20 }
  0x12   :  { %p715_p8 = por %p714_p7, %p713_p6 }
  0x14   :  { %p716_p9 = pnand %p715_p8, %p709_p5 }
  0x16   :  { %719 = shalt.err (!%p716_p9)
}
  0x17   :  { %25 = dma.hbm_to_vmem [thread:$0]  %s993_s0, 128, %s23_s17, [#allocation3]  }
  0x18   :  { %s728_s23 = scalar_lea.vmem %s50_s19, 2048  ;;  %p733_p11 = scmp.lt.s32.totalorder %s50_s19, %s50_s19 }
  0x19   :  { %p729_p10 = scmp.ne.s32.totalorder %s50_s19, %s728_s23  ;;  %p734_p12 = scmp.lt.s32.totalorder %s728_s23, %s728_s23 }
  0x1b   :  { %p735_p13 = por %p734_p12, %p733_p11 }
  0x1d   :  { %p736_p0 = pnand %p735_p13, %p729_p10 }
  0x1f   :  { %739 = shalt.err (!%p736_p0)
}
  0x20   :  { %55 = dma.hbm_to_vmem [thread:$0]  %s998_s5, 2048, %s50_s19, [#allocation5], %s745_s12, %s745_s12, %s746_s13  }
  0x21   :  { %740 = dma.done.wait [#allocation3], 128  }
  0x22   :  { %741 = vsyncadd [#allocation3], 4294967168 }
  0x23   :  { %742 = dma.done.wait [#allocation5], 4096  }
  0x24   :  { %743 = vsyncadd [#allocation5], 4294963200  ;;  %v749_v0 = vmov 0.0   ;;  %vm750_vm0 = vmmov 0   ;;  %v87_v1 = vld [vmem:[%s994_s1 + $0x78] sm:$0xff]  ;;  %v86_v2 = vld [vmem:[%s994_s1 + $0x70] sm:$0xff] }
  0x25   :  { %527 = vmatprep.subr.mxu0 %v749_v0  ;;  %559 = vmatprep.mubr.msk.f32.mxu0 %vm750_vm0, %v749_v0  ;;  %v85_v3 = vld [vmem:[%s994_s1 + $0x68] sm:$0xff]  ;;  %v84_v4 = vld [vmem:[%s994_s1 + $0x60] sm:$0xff]  ;;  %v83_v6 = vld [vmem:[%s994_s1 + $0x58] sm:$0xff]  ;;  %vm447_vm1 = vcmask 29696  }
  0x26   :  { %562 = vmatprep.subr.mxu1 %v749_v0  ;;  %594 = vmatprep.mubr.msk.f32.mxu1 %vm750_vm0, %v749_v0  ;;  %v181_v5 = vld [vmem:[#allocation4 + $0x78] sm:$0xff]  ;;  %v180_v7 = vld [vmem:[#allocation4 + $0x70] sm:$0xff]  ;;  %v179_v8 = vld [vmem:[#allocation4 + $0x68] sm:$0xff] }
  0x27   :  { %528 = vmatpush3.msra.mxu0 %v87_v1  ;;  %563 = vmatpush3.msra.mxu1 %v181_v5  ;;  %v82_v9 = vld [vmem:[%s994_s1 + $0x50] sm:$0xff]  ;;  %v178_v10 = vld [vmem:[#allocation4 + $0x60] sm:$0xff]  ;;  %v177_v12 = vld [vmem:[#allocation4 + $0x58] sm:$0xff] }
  0x28   :  { %529 = vmatprep.subr.mxu0 %v749_v0  ;;  %564 = vmatprep.subr.mxu1 %v749_v0  ;;  %v81_v11 = vld [vmem:[%s994_s1 + $0x48] sm:$0xff]  ;;  %v80_v13 = vld [vmem:[%s994_s1 + $0x40] sm:$0xff]  ;;  %v176_v14 = vld [vmem:[#allocation4 + $0x50] sm:$0xff] }
  0x29   :  { %530 = vmatpush3.msra.mxu0 %v86_v2  ;;  %565 = vmatpush3.msra.mxu1 %v180_v7  ;;  %v79_v15 = vld [vmem:[%s994_s1 + $0x38] sm:$0xff]  ;;  %v175_v16 = vld [vmem:[#allocation4 + $0x48] sm:$0xff]  ;;  %v77_v18 = vld [vmem:[%s994_s1 + $0x28] sm:$0xff] }
  0x2a   :  { %531 = vmatprep.subr.mxu0 %v749_v0  ;;  %566 = vmatprep.subr.mxu1 %v749_v0  ;;  %v78_v17 = vld [vmem:[%s994_s1 + $0x30] sm:$0xff]  ;;  %v76_v19 = vld [vmem:[%s994_s1 + $0x20] sm:$0xff]  ;;  %v75_v20 = vld [vmem:[%s994_s1 + $0x18] sm:$0xff] }
  0x2b   :  { %532 = vmatpush3.msra.mxu0 %v85_v3  ;;  %567 = vmatpush3.msra.mxu1 %v179_v8  ;;  %v74_v21 = vld [vmem:[%s994_s1 + $0x10] sm:$0xff]  ;;  %v73_v22 = vld [vmem:[%s994_s1 + $0x8] sm:$0xff]  ;;  %v72_v23 = vld [vmem:[%s994_s1] sm:$0xff] }
  0x2c   :  { %533 = vmatprep.subr.mxu0 %v749_v0  ;;  %568 = vmatprep.subr.mxu1 %v749_v0  ;;  %v71_v24 = vld [vmem:[#allocation2] sm:$0x3f]  ;;  %v174_v25 = vld [vmem:[#allocation4 + $0x40] sm:$0xff]  ;;  %v172_v27 = vld [vmem:[#allocation4 + $0x30] sm:$0xff] }
  0x2d   :  { %534 = vmatpush3.msra.mxu0 %v84_v4  ;;  %569 = vmatpush3.msra.mxu1 %v178_v10  ;;  %v173_v26 = vld [vmem:[#allocation4 + $0x38] sm:$0xff]  ;;  %v171_v28 = vld [vmem:[#allocation4 + $0x28] sm:$0xff]  ;;  %v170_v29 = vld [vmem:[#allocation4 + $0x20] sm:$0xff] }
  0x2e   :  { %535 = vmatprep.subr.mxu0 %v749_v0  ;;  %570 = vmatprep.subr.mxu1 %v749_v0  ;;  %v169_v30 = vld [vmem:[#allocation4 + $0x18] sm:$0xff]  ;;  %v168_v31 = vld [vmem:[#allocation4 + $0x10] sm:$0xff]  ;;  %v167_v32 = vld [vmem:[#allocation4 + $0x8] sm:$0xff] }
  0x2f   :  { %536 = vmatpush3.msra.mxu0 %v83_v6  ;;  %571 = vmatpush3.msra.mxu1 %v177_v12  ;;  %v166_v33 = vld [vmem:[#allocation4] sm:$0xff]  ;;  %v275_v34 = vld [vmem:[#allocation6 + $0x78] sm:$0xff]  ;;  %v274_v35 = vld [vmem:[#allocation6 + $0x70] sm:$0xff] }
  0x30   :  { %537 = vmatprep.subr.mxu0 %v749_v0  ;;  %572 = vmatprep.subr.mxu1 %v749_v0  ;;  %v273_v36 = vld [vmem:[#allocation6 + $0x68] sm:$0xff]  ;;  %v272_v37 = vld [vmem:[#allocation6 + $0x60] sm:$0xff]  ;;  %v271_v38 = vld [vmem:[#allocation6 + $0x58] sm:$0xff] }
  0x31   :  { %538 = vmatpush3.msra.mxu0 %v82_v9  ;;  %573 = vmatpush3.msra.mxu1 %v176_v14  ;;  %v270_v39 = vld [vmem:[#allocation6 + $0x50] sm:$0xff]  ;;  %v269_v40 = vld [vmem:[#allocation6 + $0x48] sm:$0xff]  ;;  %v455_v41 = vld [vmem:[%s995_s2] ss:$0 sm:$0xff] }
  0x32   :  { %539 = vmatprep.subr.mxu0 %v749_v0  ;;  %574 = vmatprep.subr.mxu1 %v749_v0  ;;  %v268_v46 = vld [vmem:[#allocation6 + $0x40] sm:$0xff]  ;;  %v267_v47 = vld [vmem:[#allocation6 + $0x38] sm:$0xff]  ;;  %v266_v48 = vld [vmem:[#allocation6 + $0x30] sm:$0xff] }
  0x33   :  { %540 = vmatpush3.msra.mxu0 %v81_v11  ;;  %575 = vmatpush3.msra.mxu1 %v175_v16  ;;  %v265_v49 = vld [vmem:[#allocation6 + $0x28] sm:$0xff]  ;;  %v264_v50 = vld [vmem:[#allocation6 + $0x20] sm:$0xff]  ;;  %v263_v51 = vld [vmem:[#allocation6 + $0x18] sm:$0xff] }
  0x34   :  { %541 = vmatprep.subr.mxu0 %v749_v0  ;;  %576 = vmatprep.subr.mxu1 %v749_v0  ;;  %v262_v52 = vld [vmem:[#allocation6 + $0x10] sm:$0xff]  ;;  %v261_v53 = vld [vmem:[#allocation6 + $0x8] sm:$0xff]  ;;  %v260_v54 = vld [vmem:[#allocation6] sm:$0xff] }
  0x35   :  { %542 = vmatpush3.msra.mxu0 %v80_v13  ;;  %577 = vmatpush3.msra.mxu1 %v174_v25  ;;  %v369_v55 = vld [vmem:[%s1000_s7 + $0x78] sm:$0xff]  ;;  %v368_v56 = vld [vmem:[%s1000_s7 + $0x70] sm:$0xff]  ;;  %v367_v57 = vld [vmem:[%s1000_s7 + $0x68] sm:$0xff] }
  0x36   :  { %543 = vmatprep.subr.mxu0 %v749_v0  ;;  %578 = vmatprep.subr.mxu1 %v749_v0  ;;  %v366_v58 = vld [vmem:[%s1000_s7 + $0x60] sm:$0xff]  ;;  %v365_v59 = vld [vmem:[%s1000_s7 + $0x58] sm:$0xff]  ;;  %v364_v60 = vld [vmem:[%s1000_s7 + $0x50] sm:$0xff] }
  0x37   :  { %544 = vmatpush3.msra.mxu0 %v79_v15  ;;  %579 = vmatpush3.msra.mxu1 %v173_v26  ;;  %v363_v61 = vld [vmem:[%s1000_s7 + $0x48] sm:$0xff]  ;;  %v456_v62 = vld [vmem:[%s997_s4] ss:$0 sm:$0xff]  ;;  %v361_v5 = vld [vmem:[%s1000_s7 + $0x38] sm:$0xff] }
  0x38   :  { %545 = vmatprep.subr.mxu0 %v749_v0  ;;  %580 = vmatprep.subr.mxu1 %v749_v0  ;;  %v362_v4 = vld [vmem:[%s1000_s7 + $0x40] sm:$0xff]  ;;  %v360_v6 = vld [vmem:[%s1000_s7 + $0x30] sm:$0xff]  ;;  %v359_v7 = vld [vmem:[%s1000_s7 + $0x28] sm:$0xff] }
  0x39   :  { %546 = vmatpush3.msra.mxu0 %v78_v17  ;;  %581 = vmatpush3.msra.mxu1 %v172_v27  ;;  %v358_v8 = vld [vmem:[%s1000_s7 + $0x20] sm:$0xff]  ;;  %v357_v9 = vld [vmem:[%s1000_s7 + $0x18] sm:$0xff]  ;;  %v356_v10 = vld [vmem:[%s1000_s7 + $0x10] sm:$0xff] }
  0x3a   :  { %547 = vmatprep.subr.mxu0 %v749_v0  ;;  %582 = vmatprep.subr.mxu1 %v749_v0  ;;  %v355_v11 = vld [vmem:[%s1000_s7 + $0x8] sm:$0xff]  ;;  %v354_v12 = vld [vmem:[%s1000_s7] sm:$0xff] }
  0x3b   :  { %548 = vmatpush3.msra.mxu0 %v77_v18  ;;  %583 = vmatpush3.msra.mxu1 %v171_v28  ;;  %v457_v13 = vld [vmem:[%s999_s6] ss:$0 sm:$0xff] }
  0x3c   :  { %549 = vmatprep.subr.mxu0 %v749_v0  ;;  %584 = vmatprep.subr.mxu1 %v749_v0  ;;  %v458_v18 = vld [vmem:[%s1001_s8] ss:$0 sm:$0xff] }
  0x3d   :  { %550 = vmatpush3.msra.mxu0 %v76_v19  ;;  %585 = vmatpush3.msra.mxu1 %v170_v29 }
  0x3e   :  { %551 = vmatprep.subr.mxu0 %v749_v0  ;;  %586 = vmatprep.subr.mxu1 %v749_v0 }
  0x3f   :  { %552 = vmatpush3.msra.mxu0 %v75_v20  ;;  %587 = vmatpush3.msra.mxu1 %v169_v30 }
  0x40   :  { %553 = vmatprep.subr.mxu0 %v749_v0  ;;  %588 = vmatprep.subr.mxu1 %v749_v0 }
  0x41   :  { %554 = vmatpush3.msra.mxu0 %v74_v21  ;;  %589 = vmatpush3.msra.mxu1 %v168_v31 }
  0x42   :  { %555 = vmatprep.subr.mxu0 %v749_v0  ;;  %590 = vmatprep.subr.mxu1 %v749_v0 }
  0x43   :  { %556 = vmatpush3.msra.mxu0 %v73_v22  ;;  %591 = vmatpush3.msra.mxu1 %v167_v32 }
  0x44   :  { %557 = vmatprep.subr.mxu0 %v749_v0  ;;  %592 = vmatprep.subr.mxu1 %v749_v0 }
  0x45   :  { %558 = vmatpush3.msra.mxu0 %v72_v23  ;;  %593 = vmatpush3.msra.mxu1 %v166_v33 }
  0x46   :  { %560 = vmatmul.mubr.f32.vlgmr.msra.gmra.mxu0 %v71_v24  ;;  %597 = vmatprep.subr.mxu0 %v749_v0 }
  0x47   :  { %629 = vmatprep.mubr.msk.f32.mxu0 %vm750_vm0, %v749_v0  ;;  %632 = vmatprep.subr.mxu1 %v749_v0 }
  0x48   :  { %598 = vmatpush3.msra.mxu0 %v275_v34 }
  0x49   :  { %599 = vmatprep.subr.mxu0 %v749_v0 }
  0x4a   :  { %600 = vmatpush3.msra.mxu0 %v274_v35 }
  0x4b   :  { %601 = vmatprep.subr.mxu0 %v749_v0 }
  0x4c   :  { %602 = vmatpush3.msra.mxu0 %v273_v36 }
  0x4d   :  { %603 = vmatprep.subr.mxu0 %v749_v0 }
  0x4e   :  { %604 = vmatpush3.msra.mxu0 %v272_v37 }
  0x4f   :  { %605 = vmatprep.subr.mxu0 %v749_v0 }
  0x50   :  { %606 = vmatpush3.msra.mxu0 %v271_v38 }
  0x51   :  { %607 = vmatprep.subr.mxu0 %v749_v0 }
  0x52   :  { %608 = vmatpush3.msra.mxu0 %v270_v39 }
  0x53   :  { %609 = vmatprep.subr.mxu0 %v749_v0 }
  0x54   :  { %610 = vmatpush3.msra.mxu0 %v269_v40 }
  0x55   :  { %611 = vmatprep.subr.mxu0 %v749_v0 }
  0x56   :  { %612 = vmatpush3.msra.mxu0 %v268_v46 }
  0x57   :  { %613 = vmatprep.subr.mxu0 %v749_v0 }
  0x58   :  { %614 = vmatpush3.msra.mxu0 %v267_v47 }
  0x59   :  { %615 = vmatprep.subr.mxu0 %v749_v0 }
  0x5a   :  { %616 = vmatpush3.msra.mxu0 %v266_v48 }
  0x5b   :  { %617 = vmatprep.subr.mxu0 %v749_v0 }
  0x5c   :  { %618 = vmatpush3.msra.mxu0 %v265_v49 }
  0x5d   :  { %619 = vmatprep.subr.mxu0 %v749_v0 }
  0x5e   :  { %620 = vmatpush3.msra.mxu0 %v264_v50 }
  0x5f   :  { %621 = vmatprep.subr.mxu0 %v749_v0 }
  0x60   :  { %622 = vmatpush3.msra.mxu0 %v263_v51 }
  0x61   :  { %623 = vmatprep.subr.mxu0 %v749_v0 }
  0x62   :  { %624 = vmatpush3.msra.mxu0 %v262_v52 }
  0x63   :  { %625 = vmatprep.subr.mxu0 %v749_v0 }
  0x64   :  { %626 = vmatpush3.msra.mxu0 %v261_v53 }
  0x65   :  { %627 = vmatprep.subr.mxu0 %v749_v0 }
  0x66   :  { %628 = vmatpush3.msra.mxu0 %v260_v54 }
 0x106   :  { %v161_v42 = vpop.f32.mrf.mxu0 }
 0x107   :  { %v162_v43 = vadd.f32 %v455_v41, %v161_v42 }
 0x108   :  { %v561_v44 = vpop.f32.mrf.mxu0 }
 0x109   :  { %674 = vtanh.f32 %v162_v43 }
 0x116   :  { %v675_v45 = vpop.eup %674 }
 0x117   :  { %595 = vmatmul.mubr.f32.vlgmr.msra.gmra.mxu1 %v675_v45 }
 0x118   :  { %664 = vmatprep.mubr.msk.f32.mxu1 %vm750_vm0, %v749_v0  ;;  %633 = vmatpush3.msra.mxu1 %v369_v55 }
 0x119   :  { %634 = vmatprep.subr.mxu1 %v749_v0 }
 0x11a   :  { %635 = vmatpush3.msra.mxu1 %v368_v56 }
 0x11b   :  { %636 = vmatprep.subr.mxu1 %v749_v0 }
 0x11c   :  { %637 = vmatpush3.msra.mxu1 %v367_v57 }
 0x11d   :  { %638 = vmatprep.subr.mxu1 %v749_v0 }
 0x11e   :  { %639 = vmatpush3.msra.mxu1 %v366_v58 }
 0x11f   :  { %640 = vmatprep.subr.mxu1 %v749_v0 }
 0x120   :  { %641 = vmatpush3.msra.mxu1 %v365_v59 }
 0x121   :  { %642 = vmatprep.subr.mxu1 %v749_v0 }
 0x122   :  { %643 = vmatpush3.msra.mxu1 %v364_v60 }
 0x123   :  { %644 = vmatprep.subr.mxu1 %v749_v0 }
 0x124   :  { %645 = vmatpush3.msra.mxu1 %v363_v61 }
 0x125   :  { %646 = vmatprep.subr.mxu1 %v749_v0 }
 0x126   :  { %647 = vmatpush3.msra.mxu1 %v362_v4 }
 0x127   :  { %648 = vmatprep.subr.mxu1 %v749_v0 }
 0x128   :  { %649 = vmatpush3.msra.mxu1 %v361_v5 }
 0x129   :  { %650 = vmatprep.subr.mxu1 %v749_v0 }
 0x12a   :  { %651 = vmatpush3.msra.mxu1 %v360_v6 }
 0x12b   :  { %652 = vmatprep.subr.mxu1 %v749_v0 }
 0x12c   :  { %653 = vmatpush3.msra.mxu1 %v359_v7 }
 0x12d   :  { %654 = vmatprep.subr.mxu1 %v749_v0 }
 0x12e   :  { %655 = vmatpush3.msra.mxu1 %v358_v8 }
 0x12f   :  { %656 = vmatprep.subr.mxu1 %v749_v0 }
 0x130   :  { %657 = vmatpush3.msra.mxu1 %v357_v9 }
 0x131   :  { %658 = vmatprep.subr.mxu1 %v749_v0 }
 0x132   :  { %659 = vmatpush3.msra.mxu1 %v356_v10 }
 0x133   :  { %660 = vmatprep.subr.mxu1 %v749_v0 }
 0x134   :  { %661 = vmatpush3.msra.mxu1 %v355_v11 }
 0x135   :  { %662 = vmatprep.subr.mxu1 %v749_v0 }
 0x136   :  { %663 = vmatpush3.msra.mxu1 %v354_v12 }
 0x1d7   :  { %v255_v63 = vpop.f32.mrf.mxu1 }
 0x1d8   :  { %v256_v1 = vadd.f32 %v456_v62, %v255_v63 }
 0x1d9   :  { %v596_v2 = vpop.f32.mrf.mxu1 }
 0x1da   :  { %676 = vtanh.f32 %v256_v1 }
 0x1e7   :  { %v677_v3 = vpop.eup %676 }
 0x1e8   :  { %630 = vmatmul.mubr.f32.vlgmr.msra.gmra.mxu0 %v677_v3 }
 0x2a8   :  { %v349_v14 = vpop.f32.mrf.mxu0 }
 0x2a9   :  { %v350_v15 = vadd.f32 %v457_v13, %v349_v14 }
 0x2aa   :  { %v631_v16 = vpop.f32.mrf.mxu0 }
 0x2ab   :  { %678 = vtanh.f32 %v350_v15 }
 0x2b8   :  { %v679_v17 = vpop.eup %678 }
 0x2b9   :  { %665 = vmatmul.mubr.f32.vlgmr.msra.gmra.mxu1 %v679_v17 }
 0x379   :  { %v443_v19 = vpop.f32.mrf.mxu1 }
 0x37a   :  { %v444_v20 = vadd.f32 %v458_v18, %v443_v19 }
 0x37b   :  { %v666_v21 = vpop.f32.mrf.mxu1 }
 0x37c   :  { %448 = vst.msk [vmem:[%s1002_s9] sm:$0x3f] %vm447_vm1, %v444_v20 }
 0x37d   :  { %453 = vsyncpa [#allocation3], 1 }
 0x37e   :  { %454 = vsyncpa [#allocation5], 1 }

</bundles_post_ra>
